<compile_context>
chip_gen: v6e
topology: v6e:2x2x1
jax: 0.10.0
libtpu: 0.0.40
codegen_flags: <defaults>
</compile_context>

<pallas_src>
import functools

import jax
import jax.numpy as jnp
from jax.experimental import pallas as pl
from jax.experimental.pallas import tpu as pltpu

EPS = 1e-10

# Below this many bytes the fixed pallas_call launch / single-step grid cost
# dominates a mem-bound elementwise op, so the dispatcher lets XLA fuse the
# pure-JAX form instead (gap is largest on v7x's 3.2 TB/s HBM).
_SMALL_INPUT_BYTES = 2 << 20  # 2 MiB


# ----------------------------------------------------------------------------
# Helpers
# ----------------------------------------------------------------------------
def _round_up(n: int, m: int) -> int:
    return ((n + m - 1) // m) * m


def _sublane_pack(dtype) -> int:
    # Rows per packed vreg sublane group: f32 -> 8, bf16 -> 16, int8/fp8 -> 32.
    return max(8, 32 // jnp.dtype(dtype).itemsize)


def _vmem_limit_bytes() -> int:
    """Generation-aware scoped-VMEM request (never more than half physical)."""
    phys = 64 << 20  # conservative default: v7x per-TensorCore physical VMEM
    try:
        phys = int(getattr(pltpu.get_tpu_info(), "vmem_capacity_bytes", phys))
    except Exception:
        pass
    # 32 MiB is plenty for 4 double-buffered ~4 MiB tiles, safe on v5e/v6e
    # (128 MiB physical) and v7x (64 MiB physical).
    return min(32 << 20, max(16 << 20, phys // 2))


def _pick_tb(B: int, row_bytes: int, pack: int, tile_budget: int) -> int:
    """Largest batch tile (rows, sublane-packed) within the per-tile budget."""
    tb = max(pack, (tile_budget // max(row_bytes, 1)) // pack * pack)
    tb = min(tb, _round_up(B, pack))
    # Guarantee >= 2 grid steps when B allows it, so the "parallel" batch axis
    # can be sharded across both TensorCores on 2-TC parts (v7x); elsewhere
    # the extra grid step is ~0.35us, i.e. noise for inputs this size.
    if tb >= B and B > pack:
        tb = _round_up(pl.cdiv(B, 2), pack)
    return tb


# ----------------------------------------------------------------------------
# Single-pass kernel (row tile holds the full feature axis)
# ----------------------------------------------------------------------------
def _l1norm_kernel(x_ref, o_ref):
    """One (tb, D) row tile: out = x / (sum(|x|, axis=1) + eps)."""
    x = x_ref[...]
    # Accumulate |x| in f32 regardless of input dtype.
    l1 = jnp.sum(jnp.abs(x).astype(jnp.float32), axis=1, keepdims=True) + EPS
    # One exact divide per ROW; the per-element work is a broadcast multiply
    # in the INPUT dtype (no full-tile f32 intermediate for bf16/fp8 inputs).
    inv = 1.0 / l1
    o_ref[...] = (x * inv.astype(x.dtype)).astype(o_ref.dtype)


def _l1norm_rows(x: jax.Array, tb: int, vmem_limit: int) -> jax.Array:
    B, D = x.shape
    grid = (pl.cdiv(B, tb),)
    return pl.pallas_call(
        _l1norm_kernel,
        out_shape=jax.ShapeDtypeStruct((B, D), x.dtype),
        grid_spec=pltpu.PrefetchScalarGridSpec(
            num_scalar_prefetch=0,
            grid=grid,
            in_specs=[pl.BlockSpec((tb, D), lambda i: (i, 0))],
            out_specs=pl.BlockSpec((tb, D), lambda i: (i, 0)),
        ),
        compiler_params=pltpu.CompilerParams(
            dimension_semantics=("parallel",),
            vmem_limit_bytes=vmem_limit,
        ),
    )(x)


# ----------------------------------------------------------------------------
# Wide-row fallback: two passes with a D-split (robustness for huge D)
# ----------------------------------------------------------------------------
def _l1_rowsum_kernel(x_ref, norm_ref, *, td, d_total, mask_last):
    """Accumulate per-row sum(|x|) over the D grid axis into norm_ref."""
    k = pl.program_id(1)

    @pl.when(k == 0)
    def _():
        norm_ref[...] = jnp.zeros_like(norm_ref)

    a = jnp.abs(x_ref[...]).astype(jnp.float32)
    if mask_last:
        # Last D block may read past D: zero the OOB columns so they don't
        # contaminate the L1 sum of valid rows.
        col = jax.lax.broadcasted_iota(jnp.int32, a.shape, 1) + k * td
        a = jnp.where(col < d_total, a, 0.0)
    norm_ref[...] += jnp.sum(a, axis=1, keepdims=True)

    @pl.when(k == pl.num_programs(1) - 1)
    def _():
        norm_ref[...] = norm_ref[...] + EPS


def _l1_scale_kernel(x_ref, norm_ref, o_ref):
    x = x_ref[...]
    inv = 1.0 / norm_ref[...]                       # (tb, 1) f32, exact
    o_ref[...] = (x * inv.astype(x.dtype)).astype(o_ref.dtype)


def _l1norm_wide(x: jax.Array, *, tb: int | None = None, td: int | None = None,
                 vmem_limit: int | None = None) -> jax.Array:
    """Two-pass path for rows too wide for a single VMEM-resident row tile."""
    B, D = x.shape
    dtype = x.dtype
    pack = _sublane_pack(dtype)
    isz = jnp.dtype(dtype).itemsize
    if vmem_limit is None:
        vmem_limit = _vmem_limit_bytes()
    tile_budget = vmem_limit // 8

    if tb is None:
        tb = pack
    if td is None:
        td = max(128, (tile_budget // max(tb * isz, 1)) // 128 * 128)
    td = min(td, _round_up(D, 128))

    gb, gd = pl.cdiv(B, tb), pl.cdiv(D, td)
    rowsum = functools.partial(_l1_rowsum_kernel, td=td, d_total=D,
                               mask_last=(D % td != 0))

    norms = pl.pallas_call(
        rowsum,
        out_shape=jax.ShapeDtypeStruct((B, 1), jnp.float32),
        grid_spec=pltpu.PrefetchScalarGridSpec(
            num_scalar_prefetch=0,
            grid=(gb, gd),
            in_specs=[pl.BlockSpec((tb, td), lambda i, k: (i, k))],
            out_specs=pl.BlockSpec((tb, 1), lambda i, k: (i, 0)),
        ),
        compiler_params=pltpu.CompilerParams(
            dimension_semantics=("parallel", "arbitrary"),
            vmem_limit_bytes=vmem_limit,
        ),
    )(x)

    return pl.pallas_call(
        _l1_scale_kernel,
        out_shape=jax.ShapeDtypeStruct((B, D), dtype),
        grid_spec=pltpu.PrefetchScalarGridSpec(
            num_scalar_prefetch=0,
            grid=(gb, gd),
            in_specs=[pl.BlockSpec((tb, td), lambda i, k: (i, k)),
                      pl.BlockSpec((tb, 1), lambda i, k: (i, 0))],
            out_specs=pl.BlockSpec((tb, td), lambda i, k: (i, k)),
        ),
        compiler_params=pltpu.CompilerParams(
            dimension_semantics=("parallel", "parallel"),
            vmem_limit_bytes=vmem_limit,
        ),
    )(x, norms)


# ----------------------------------------------------------------------------
# Public entry points
# ----------------------------------------------------------------------------
def l1norm_pallas(x: jax.Array, *, tb: int | None = None) -> jax.Array:
    """Row-wise L1 normalization of a (B, D) array via Pallas TPU kernels."""
    assert x.ndim == 2, "L1Norm kernel expects a 2-D (batch, features) array"
    B, D = x.shape
    pack = _sublane_pack(x.dtype)
    row_bytes = D * jnp.dtype(x.dtype).itemsize
    vmem_limit = _vmem_limit_bytes()
    tile_budget = vmem_limit // 8            # 4 double-buffered tiles + slack

    if pack * row_bytes > tile_budget:
        # Rows too wide to hold a full row tile in VMEM: split D instead.
        return _l1norm_wide(x, vmem_limit=vmem_limit)

    if tb is None:
        tb = _pick_tb(B, row_bytes, pack, tile_budget)
    return _l1norm_rows(x, tb, vmem_limit)


def l1norm(x: jax.Array) -> jax.Array:
    """Dispatch: tiny inputs go straight to XLA, large ones to the kernel."""
    if x.size * jnp.dtype(x.dtype).itemsize < _SMALL_INPUT_BYTES:
        return x / (jnp.sum(jnp.abs(x), axis=1, keepdims=True) + EPS)
    return l1norm_pallas(x)


def _ref(x):
    return x / (jnp.sum(jnp.abs(x), axis=1, keepdims=True) + EPS)


if __name__ == "__main__":
    key = jax.random.PRNGKey(0)
    k1, k2, k3, k4 = jax.random.split(key, 4)

    # Case 1: unaligned (B, D) -> ragged last batch block, full-dim D block.
    x1 = jax.random.normal(k1, (37, 96), dtype=jnp.float32)
    out1 = jax.block_until_ready(l1norm_pallas(x1))
    assert out1.shape == x1.shape and out1.dtype == x1.dtype
    assert jnp.allclose(out1, _ref(x1), atol=1e-6, rtol=1e-5)

    # Case 2: lane-aligned shape, >= 2 grid steps (megacore-friendly split).
    x2 = jax.random.normal(k2, (64, 128), dtype=jnp.float32)
    out2 = jax.block_until_ready(l1norm_pallas(x2))
    assert jnp.allclose(out2, _ref(x2), atol=1e-6, rtol=1e-5)

    # Case 3: bf16 input (f32 reduction, bf16 normalize multiply).
    x3 = jax.random.normal(k3, (48, 256), dtype=jnp.bfloat16)
    out3 = jax.block_until_ready(l1norm_pallas(x3))
    ref3 = _ref(x3.astype(jnp.float32))
    assert jnp.allclose(out3.astype(jnp.float32), ref3, atol=1e-2, rtol=3e-2)

    # Case 4: wide-row (D-split) fallback, forced to small tiles so the
    # reduction axis really has several steps (ragged in both B and D).
    x4 = jax.random.normal(k4, (13, 300), dtype=jnp.float32)
    out4 = jax.block_until_ready(_l1norm_wide(x4, tb=8, td=128))
    assert jnp.allclose(out4, _ref(x4), atol=1e-6, rtol=1e-5)

    # Dispatcher sanity check (tiny input takes the pure-JAX fast path).
    out5 = jax.block_until_ready(l1norm(x1))
    assert jnp.allclose(out5, _ref(x1), atol=1e-6, rtol=1e-5)

    print("KERNEL_OK")
</pallas_src>

<mosaic_0001>
module attributes {stable_mosaic.version = 11 : i64} {
  func.func @_l1norm_kernel(%arg0: i32, %arg1: memref<24x96xf32, #tpu.memory_space<vmem>>, %arg2: memref<24x96xf32, #tpu.memory_space<vmem>>) attributes {dimension_semantics = [#tpu.dimension_semantics<parallel>], iteration_bounds = array<i64: 2>, scalar_prefetch = 0 : i64, scratch_operands = 0 : i64, tpu.core_type = #tpu.core_type<tc>, window_params = [{transform_indices = @transform_0, window_bounds = array<i64: 24, 96>}, {transform_indices = @transform_1, window_bounds = array<i64: 24, 96>}]} {
    %c0 = arith.constant 0 : index
    %c0_0 = arith.constant 0 : index
    %0 = vector.load %arg1[%c0, %c0_0] : memref<24x96xf32, #tpu.memory_space<vmem>>, vector<24x96xf32>
    %1 = math.absf %0 : vector<24x96xf32>
    %cst = arith.constant dense<0.000000e+00> : vector<24xf32>
    %2 = vector.multi_reduction <add>, %1, %cst [1] : vector<24x96xf32> to vector<24xf32>
    %3 = vector.shape_cast %2 : vector<24xf32> to vector<24x1xf32>
    %cst_1 = arith.constant 1.000000e-10 : f32
    %4 = vector.broadcast %cst_1 : f32 to vector<24x1xf32>
    %5 = arith.addf %3, %4 : vector<24x1xf32>
    %cst_2 = arith.constant 1.000000e+00 : f32
    %6 = vector.broadcast %cst_2 : f32 to vector<24x1xf32>
    %7 = arith.divf %6, %5 : vector<24x1xf32>
    %8 = vector.broadcast %7 : vector<24x1xf32> to vector<24x96xf32>
    %9 = arith.mulf %0, %8 : vector<24x96xf32>
    %c0_3 = arith.constant 0 : index
    %c0_4 = arith.constant 0 : index
    %10 = vector.load %arg2[%c0_3, %c0_4] : memref<24x96xf32, #tpu.memory_space<vmem>>, vector<24x96xf32>
    tpu.vector_store %arg2[%c0_3, %c0_4], %9 {strides = array<i32>} : memref<24x96xf32, #tpu.memory_space<vmem>>, vector<24x96xf32>,
    return
  }
  func.func @transform_0(%arg0: i32) -> (i32, i32) {
    %c0_i32 = arith.constant 0 : i32
    %c0_i32_0 = arith.constant 0 : i32
    return %arg0, %c0_i32 : i32, i32
  }
  func.func @transform_1(%arg0: i32) -> (i32, i32) {
    %c0_i32 = arith.constant 0 : i32
    %c0_i32_0 = arith.constant 0 : i32
    return %arg0, %c0_i32 : i32, i32
  }
}

</mosaic_0001>

<bundles_post_ra>
// kernel: tpu_custom_call.1
= control target key start
LH: loop header
LB: loop body
LE: loop exit
PB: predicated region body
PF: predicated region fallthrough
CT: control target
= control target key end

     0   :  { %6 = vsyncpa [#allocation3], 0  ;;  %s630_s0 = inlined_call_operand.hbm [shape: f32[37,96], index: 0, kind: input, shape index: {}]   ;;  %s631_s1 = inlined_call_operand.hbm [shape: f32[37,96], index: 1, kind: output, shape index: {}]  }
   0x1   :  { %8 = vsyncpa [#allocation3 + $0x1], 0 }
   0x2   :  { %9 = vsyncpa [#allocation4], 0 }
   0x3   :  { %11 = vsyncpa [#allocation4 + $0x1], 0  ;;  %s452_s6 = smov 0   ;;  %s454_s7 = smov 0  }
   0x4   :  { %s456_s8 = smov 0   ;;  %s458_s9 = smov 0  }
   0x5 LB: > { %s473_s10 = sadd.s32 4294967295, %s434_s9   ;;  %s275_s11 = sadd.s32 4294967294, %s434_s9   ;;  %s434_s9 = sphi %s458_s9, %s641_s9   ;;  %s430_s8 = sphi %s456_s8, %s640_s8   ;;  %s426_s7 = sphi %s454_s7, %s639_s7   ;;  %s422_s6 = sphi %s452_s6, %s638_s6  }
   0x6   : > { %s477_s12 = sadd.s32 1, %s434_s9   ;;  %s24_s13 = sadd.s32 1, %s430_s8 }
   0x7   : > { %s21_s14 = ssub.s32 %s434_s9, %s477_s12  ;;  %p31_p0 = scmp.ne.s32.totalorder %s430_s8, %s426_s7 }
   0x8   : > { %p22_p1 = scmp.eq.s32.totalorder %s21_s14, 0  ;;  %p32_p2 = scmp.eq.s32.totalorder %s434_s9, 0 }
   0x9   : > { %p37_p3 = scmp.ne.s32.totalorder %s426_s7, %s422_s6  ;;  %p38_p4 = scmp.eq.s32.totalorder %s473_s10, 0 }
   0xa   : > { %s489_s15 = scalar_select %p22_p1, %s430_s8, %s24_s13  }
   0xb   : > { %p33_p5 = por %p32_p2, %p31_p0  ;;  %p491_p6 = por %p38_p4, %p37_p3 }
   0xc   : > { %p61_p7 = scmp.eq.s32.totalorder %s473_s10, 1  ;;  %p67_p8 = scmp.eq.s32.totalorder %s275_s11, 1 }
   0xd   : > { %p632_p11 = scmp.ge.s32.totalorder %s434_s9, 2 }
   0xe   : > { %p496_p9 = por %p61_p7, %p31_p0  ;;  %p500_p10 = por %p67_p8, %p37_p3 }
   0xf   : > { %83 = sbr.rel (%p632_p11) target bundleno = 54 (0x36), region = 16 }
  0x10   : > { %s635_s18 = scalar_select %p500_p10, 1, 0 }
  0x14   : > { %86 = sbr.rel (!%p33_p5) target bundleno = 54 (0x36), region = 20  ;;  %s87_s19 = sand.u32 (%p33_p5), 1, %s430_s8  }
  0x15   : > { %s92_s20 = smul.u32 (%p33_p5), 3, %s434_s9  ;;  %s512_s25 = scalar_lea.sflag (%p33_p5), [#allocation3], %s87_s19 }
  0x16   : > { %s293_s21 = smul.u32 (%p33_p5), 24, %s87_s19 }
  0x17   : > { %s93_s22 = ssub.s32 (%p33_p5), 5, %s92_s20 }
  0x18   : > { %p94_p12 = scmp.lt.s32.totalorder (%p33_p5), %s93_s22, 3  ;;  %s91_s26 = scalar_lea.vmem (%p33_p5), [#allocation2], %s293_s21 }
  0x1a   : > { %s643_s22 = smov (!%p94_p12, %s93_s22), 3 }
  0x1b   : > { %s509_s23 = sshll.u32 %s643_s22, 7 }
  0x1c   : > { %s98_s24 = ssub.s32 384, %s509_s23 }
  0x1d   : > { %99 = vsyncadd %s512_s25, %s98_s24  ;;  %p279_p13 = scmp.ne.s32.totalorder %s509_s23, 0  ;;  %s291_s27 = smul.u32 384, %s434_s9 }
  0x1e   : > { %s104_s28 = sshll.u32 %s91_s26, 4  ;;  %s348_s11 = scalar_lea.hbm %s630_s0, 640  ;;  %s522_s28 = int_to_ptr.vmem [resolvable:$true] %s104_s28 }
  0x1f   : > { %s520_s2 = scalar_lea.hbm %s630_s0, %s291_s27 }
  0x20   : > { %s344_s3 = scalar_lea.hbm %s520_s2, %s509_s23  ;;  %p349_p3 = scmp.lt.s32.totalorder %s520_s2, %s630_s0 }
  0x21   : > { %p345_p0 = scmp.ne.s32.totalorder %s520_s2, %s344_s3  ;;  %p350_p4 = scmp.lt.s32.totalorder %s348_s11, %s344_s3 }
  0x23   : > { %p346_p1 = pnand %p345_p0, %p279_p13  ;;  %p351_p5 = por %p350_p4, %p349_p3 }
  0x25   : > { %p347_p2 = pneg %p346_p1 }
  0x27   : > { %p352_p7 = pnand %p351_p5, %p347_p2 }
  0x29   : > { %355 = shalt.err (!%p352_p7)
}
  0x2a   : > { %s356_s19 = scalar_lea.vmem %s522_s28, %s509_s23  ;;  %s436_s20 = smov [#allocation2]  }
  0x2b   : > { %p357_p8 = scmp.ne.s32.totalorder %s522_s28, %s356_s19  ;;  %s360_s21 = sshll.u32 %s436_s20, 4  ;;  %s361_s21 = int_to_ptr.vmem [resolvable:$false] %s360_s21 }
  0x2c   : > { %s362_s22 = scalar_lea.vmem %s361_s21, 768  ;;  %p363_p1 = scmp.lt.s32.totalorder %s522_s28, %s361_s21 }
  0x2d   : > { %p358_p12 = pnand %p357_p8, %p279_p13  ;;  %p364_p11 = scmp.lt.s32.totalorder %s362_s22, %s356_s19 }
  0x2f   : > { %p359_p0 = pneg %p358_p12  ;;  %p365_p10 = por %p364_p11, %p363_p1 }
  0x31   : > { %p366_p3 = pnand %p365_p10, %p359_p0 }
  0x33   : > { %369 = shalt.err (!%p366_p3)
}
  0x34   : > { %s437_s24 = smov 128   ;;  %s438_s26 = smov 8  }
  0x35   : > { %110 = dma.hbm_to_vmem [thread:$0]  (%p279_p13), %s520_s2, %s509_s23, %s522_s28, %s512_s25, %s437_s24, %s437_s24, %s438_s26  }
  0x36 PF: > { %p283_p2 = scmp.ge.s32.totalorder %s434_s9, 1  ;;  %p112_p4 = scmp.lt.s32.totalorder %s434_s9, 3 }
  0x38   : > { %p113_p5 = pnand %p283_p2, %p112_p4 }
  0x39   : > { %s551_s27 = sand.u32 (!%p113_p5), 1, %s426_s7  }
  0x3a   : > { %116 = sbr.rel (%p113_p5) target bundleno = 256 (0x100), region = 24  ;;  %s119_s30 = scalar_lea.sflag (!%p113_p5), [#allocation3], %s551_s27 }
  0x3b   : > { %s294_s29 = smul.u32 (!%p113_p5), 24, %s551_s27 }
  0x3d   : > { %s122_s3 = scalar_lea.vmem (!%p113_p5), [#allocation2], %s294_s29 }
  0x3f   : > { %413 = dma.done.wait (%p491_p6), %s119_s30, 384  }
  0x40   : > { %415 = vsyncadd (%p491_p6), %s119_s30, 4294966912  ;;  %v151_v0 = vld [vmem:[%s122_s3] sm:$0xff]  ;;  %vm157_vm0 = vcmask 785408   ;;  %v153_v1 = vld [vmem:[%s122_s3 + $0x10] sm:$0xff]  ;;  %s140_s16 = scalar_lea.vmem [#allocation5], %s294_s29  ;;  %s183_s23 = scalar_lea.sflag [#allocation4], %s551_s27 }
  0x41   : > { %v152_v2 = vld [vmem:[%s122_s3 + $0x8] sm:$0xff]  ;;  %v154_v3 = vand.u32 2147483647, %v151_v0  ;;  %v156_v4 = vand.u32 2147483647, %v153_v1  ;;  %s190_s25 = smul.u32 (%p496_p9), 3, %s473_s10 }
  0x42   : > { %v155_v5 = vand.u32 2147483647, %v152_v2 }
  0x43   : > { %v158_v6 = vsel %vm157_vm0, %v154_v3, 0.0  ;;  %v164_v7 = vsel %vm157_vm0, %v156_v4, 0.0  ;;  %s191_s28 = ssub.s32 (%p496_p9), 5, %s190_s25 }
  0x44   : > { %159 = vadd.xlane.f32.xlu0 %v158_v6  ;;  %165 = vadd.xlane.f32.xlu1 %v164_v7  ;;  %v161_v8 = vsel %vm157_vm0, %v155_v5, 0.0  ;;  %p192_p6 = scmp.lt.s32.totalorder (%p496_p9), %s191_s28, 3 }
  0x48   : > { %162 = vadd.xlane.f32.xlu0 %v161_v8 }
  0xcd   : > { %v160_v9 = vpop.xlane.xlu0 %159  ;;  %v166_v10 = vpop.xlane.xlu1 %165 }
  0xce   : > { %v167_v11 = vadd.f32 1e-10, %v160_v9  ;;  %v169_v12 = vadd.f32 1e-10, %v166_v10 }
  0xd0   : > { %338 = vrcp.f32 %v167_v11 }
  0xd1   : > { %340 = vrcp.f32 %v169_v12  ;;  %v163_v13 = vpop.xlane.xlu0 %162 }
  0xd2   : > { %v168_v14 = vadd.f32 1e-10, %v163_v13 }
  0xd4   : > { %342 = vrcp.f32 %v168_v14 }
  0xdd   : > { %v339_v15 = vpop.eup %338 }
  0xde   : > { %v341_v16 = vpop.eup %340  ;;  %v176_v17 = vmul.f32 %v339_v15, %v151_v0 }
  0xdf   : > { %v178_v18 = vmul.f32 %v341_v16, %v153_v1 }
  0xe0   : > { %179 = vst.msk [vmem:[%s140_s16] sm:$0xff] %vm157_vm0, %v176_v17  ;;  %189 = sbr.rel (!%p496_p9) target bundleno = 256 (0x100), region = 32 }
  0xe1   : > { %v343_v19 = vpop.eup %342  ;;  %181 = vst.msk [vmem:[%s140_s16 + $0x10] sm:$0xff] %vm157_vm0, %v178_v18 }
  0xe2   : > { %v177_v20 = vmul.f32 %v343_v19, %v152_v2 }
  0xe4   : > { %180 = vst.msk [vmem:[%s140_s16 + $0x8] sm:$0xff] %vm157_vm0, %v177_v20 }
  0xe5   : > { %s645_s28 = smov (!%p192_p6, %s191_s28), 3 }
  0xe6   : > { %s573_s2 = sshll.u32 %s645_s28, 7 }
  0xe7   : > { %s196_s4 = ssub.s32 384, %s573_s2 }
  0xe8   : > { %197 = vsyncadd %s183_s23, %s196_s4  ;;  %p285_p10 = scmp.ne.s32.totalorder %s573_s2, 0  ;;  %s292_s5 = smul.u32 384, %s473_s10 }
  0xe9   : > { %s202_s17 = sshll.u32 %s140_s16, 4  ;;  %s439_s20 = smov [#allocation5]   ;;  %s585_s17 = int_to_ptr.vmem [resolvable:$true] %s202_s17 }
  0xea   : > { %s583_s14 = scalar_lea.hbm %s631_s1, %s292_s5  ;;  %s370_s19 = scalar_lea.vmem %s585_s17, %s573_s2 }
  0xeb   : > { %p371_p9 = scmp.ne.s32.totalorder %s585_s17, %s370_s19  ;;  %s374_s21 = sshll.u32 %s439_s20, 4  ;;  %s375_s21 = int_to_ptr.vmem [resolvable:$false] %s374_s21 }
  0xec   : > { %s376_s10 = scalar_lea.vmem %s375_s21, 768  ;;  %p377_p7 = scmp.lt.s32.totalorder %s585_s17, %s375_s21 }
  0xed   : > { %p372_p11 = pnand %p371_p9, %p285_p10  ;;  %p378_p8 = scmp.lt.s32.totalorder %s376_s10, %s370_s19 }
  0xef   : > { %p373_p13 = pneg %p372_p11  ;;  %p379_p12 = por %p378_p8, %p377_p7 }
  0xf1   : > { %p380_p0 = pnand %p379_p12, %p373_p13 }
  0xf3   : > { %383 = shalt.err (!%p380_p0)
}
  0xf4   : > { %s384_s22 = scalar_lea.hbm %s583_s14, %s573_s2  ;;  %s388_s29 = scalar_lea.hbm %s631_s1, 640 }
  0xf5   : > { %p385_p1 = scmp.ne.s32.totalorder %s583_s14, %s384_s22  ;;  %p389_p4 = scmp.lt.s32.totalorder %s583_s14, %s631_s1 }
  0xf6   : > { %p390_p5 = scmp.lt.s32.totalorder %s388_s29, %s384_s22 }
  0xf7   : > { %p386_p3 = pnand %p385_p1, %p285_p10 }
  0xf8   : > { %p391_p6 = por %p390_p5, %p389_p4 }
  0xf9   : > { %p387_p2 = pneg %p386_p3 }
  0xfb   : > { %p392_p9 = pnand %p391_p6, %p387_p2 }
  0xfd   : > { %395 = shalt.err (!%p392_p9)
}
  0xfe   : > { %s440_s16 = smov 128   ;;  %s441_s25 = smov 8  }
  0xff   : > { %208 = dma.vmem_to_hbm [thread:$0]  (%p285_p10), %s585_s17, %s573_s2, %s583_s14, %s183_s23, %s440_s16, %s440_s16, %s441_s25  }
 0x100 PF: > { %s217_s28 = sand.u32 1, %s422_s6   ;;  %p636_p11 = scmp.ne.s32.totalorder %s635_s18, 0 }
 0x101   : > { %p637_p13 = scmp.ge.s32.totalorder %s434_s9, 2  ;;  %s218_s4 = scalar_lea.sflag [#allocation4], %s217_s28 }
 0x103   : > { %p298_p7 = pnand %p637_p13, %p636_p11 }
 0x105   : > { %p299_p8 = pneg %p298_p7 }
 0x107   : > { %417 = dma.done.wait (%p299_p8), %s218_s4, 384  }
 0x108   : > { %419 = vsyncadd (%p299_p8), %s218_s4, 4294966912  ;;  %p14_p12 = scmp.ge.s32.totalorder %s477_s12, 4   ;;  %s638_s6 = smov %s426_s7 }
 0x109   : > { %s639_s7 = smov %s430_s8  ;;  %s640_s8 = smov %s489_s15 }
 0x10a   : > { %s641_s9 = smov %s477_s12  ;;  %16 = sbr.rel (!%p14_p12) target bundleno = 5 (0x5), region = 69 }
 0x10f   :  { %223 = vsyncpa [#allocation3], 1 }
 0x110   :  { %225 = vsyncpa [#allocation3 + $0x1], 1 }
 0x111   :  { %226 = vsyncpa [#allocation4], 1 }
 0x112   :  { %228 = vsyncpa [#allocation4 + $0x1], 1 }

</bundles_post_ra>
